<compile_context>
chip_gen: v7x
topology: tpu7x:2x2x1
jax: 0.10.0
libtpu: 0.0.40
codegen_flags: <defaults>
</compile_context>

<pallas_src>
import math
import jax
import jax.numpy as jnp
from jax.experimental import pallas as pl
from jax.experimental.pallas import tpu as pltpu

# ---------------- config (small, consistent with the module) ----------------
B = 2           # batch
T = 8           # sequence length (<= block_size)
C = 32          # n_embd
H = 4           # n_head
D = C // H      # head dim
CP = 128        # proj output width padded to a 128-lane multiple (lane-dense store)


def causal_attention_kernel(x_ref, wqkv_ref, bqkv_ref, wph_ref, bp_ref, o_ref):
    # Per grid step (one batch element):
    #   x_ref   : (T, C)      f32
    #   wqkv_ref: (C, 3C)     bf16   [Wq | Wk | Wv]   (stored (in, out))
    #   bqkv_ref: (1, 3C)     f32    [bq | bk | bv]
    #   wph_ref : (H, D, CP)  bf16   Wproj split per head, zero-padded to CP lanes
    #   bp_ref  : (1, CP)     f32    bproj zero-padded
    #   o_ref   : (T, CP)     f32    proj output in columns [0:C)
    xb = x_ref[...].astype(jnp.bfloat16)

    # ---- fused Q/K/V projection: one bf16 MXU pass, f32 accumulation ----
    qkv = jnp.dot(xb, wqkv_ref[...], preferred_element_type=jnp.float32) + bqkv_ref[...]
    q = qkv[:, 0 * C:1 * C]
    k = qkv[:, 1 * C:2 * C]
    v = qkv[:, 2 * C:3 * C]

    # ---- causal mask, built once for all heads ----
    row = jax.lax.broadcasted_iota(jnp.int32, (T, T), 0)
    col = jax.lax.broadcasted_iota(jnp.int32, (T, T), 1)
    causal = col <= row

    scale = 1.0 / math.sqrt(D)
    neg_big = jnp.float32(-1e30)        # large finite; safe because the diagonal is never masked

    # Output projection distributed per head: acc += (softmax(q_h k_h^T) v_h) @ Wproj_h.
    # No head-concat is ever materialized.
    acc = jnp.zeros((T, CP), jnp.float32)
    for h in range(H):                   # short static loop; D=8 lane slices are unavoidable here
        sl = slice(h * D, (h + 1) * D)
        qh = q[:, sl].astype(jnp.bfloat16)           # (T, D)
        kh = k[:, sl].astype(jnp.bfloat16)
        vh = v[:, sl].astype(jnp.bfloat16)

        s = jnp.einsum('td,sd->ts', qh, kh,
                       preferred_element_type=jnp.float32) * scale     # (T, T) f32
        s = jnp.where(causal, s, neg_big)
        s = s - jnp.max(s, axis=-1, keepdims=True)
        p = jnp.exp(s)
        p = p * pl.reciprocal(jnp.sum(p, axis=-1, keepdims=True), approx=True)
        # TODO(synk): attn_drop / resid_drop are no-ops here (eval-mode); train-mode dropout
        #             would use pltpu.prng_seed + pltpu.prng_random_bits.

        yh = jnp.dot(p.astype(jnp.bfloat16), vh,
                     preferred_element_type=jnp.float32)                # (T, D) f32
        acc = acc + jnp.dot(yh.astype(jnp.bfloat16), wph_ref[h],
                            preferred_element_type=jnp.float32)         # (T, CP) f32

    # Lane-dense (128-wide) unmasked store; wrapper slices columns [0:C).
    o_ref[...] = acc + bp_ref[...]


def causal_self_attention(x, wq, bq, wk, bk, wv, bv, wp, bp):
    # Host-side packing: QKV weights in one bf16 slab, proj weights split per head and padded
    # to a 128-lane output width.  x is pre-flattened to (B*T, C).
    x2d = x.reshape(B * T, C)
    w_qkv = jnp.concatenate([wq, wk, wv], axis=1).astype(jnp.bfloat16)          # (C, 3C)
    b_qkv = jnp.concatenate([bq, bk, bv], axis=1)                               # (1, 3C) f32
    wp_pad = jnp.zeros((C, CP), jnp.float32).at[:, :C].set(wp)
    wp_heads = wp_pad.reshape(H, D, CP).astype(jnp.bfloat16)                    # (H, D, CP)
    bp_pad = jnp.zeros((1, CP), jnp.float32).at[:, :C].set(bp)                  # (1, CP) f32

    out = pl.pallas_call(
        causal_attention_kernel,
        out_shape=jax.ShapeDtypeStruct((B * T, CP), jnp.float32),
        grid=(B,),
        in_specs=[
            pl.BlockSpec((T, C), lambda b: (b, 0)),          # x rows for batch element b
            pl.BlockSpec((C, 3 * C), lambda b: (0, 0)),      # packed QKV weights (bf16)
            pl.BlockSpec((1, 3 * C), lambda b: (0, 0)),      # packed QKV biases
            pl.BlockSpec((H, D, CP), lambda b: (0, 0, 0)),   # per-head proj weights (bf16)
            pl.BlockSpec((1, CP), lambda b: (0, 0)),         # padded proj bias
        ],
        out_specs=pl.BlockSpec((T, CP), lambda b: (b, 0)),
        compiler_params=pltpu.CompilerParams(
            dimension_semantics=("parallel",)),              # shard batch across TCs on v7x
    )(x2d, w_qkv, b_qkv, wp_heads, bp_pad)

    # Layout plumbing outside the kernel: drop the pad columns, restore (B, T, C).
    return out[:, :C].reshape(B, T, C)


# ---------------- pure-JAX reference (matches the PyTorch forward, eval mode) ----------------
def reference(x, wq, bq, wk, bk, wv, bv, wp, bp):
    q = x @ wq + bq
    k = x @ wk + bk
    v = x @ wv + bv
    q = q.reshape(B, T, H, D).transpose(0, 2, 1, 3)
    k = k.reshape(B, T, H, D).transpose(0, 2, 1, 3)
    v = v.reshape(B, T, H, D).transpose(0, 2, 1, 3)
    att = (q @ jnp.swapaxes(k, -2, -1)) * (1.0 / math.sqrt(D))
    mask = jnp.tril(jnp.ones((T, T), bool))
    att = jnp.where(mask, att, -jnp.inf)
    att = jax.nn.softmax(att, axis=-1)
    y = (att @ v).transpose(0, 2, 1, 3).reshape(B, T, C)
    return y @ wp + bp


if __name__ == "__main__":
    key = jax.random.PRNGKey(0)
    ks = jax.random.split(key, 9)

    x = jax.random.normal(ks[0], (B, T, C), jnp.float32)

    # Weights stored pre-transposed to (in, out); biases as (1, C) rows.
    def w(k):
        return jax.random.normal(k, (C, C), jnp.float32) * 0.02

    def b(k):
        return jax.random.normal(k, (1, C), jnp.float32) * 0.02

    wq, wk, wv, wp = w(ks[1]), w(ks[2]), w(ks[3]), w(ks[4])
    bq, bk, bv, bp = b(ks[5]), b(ks[6]), b(ks[7]), b(ks[8])

    out = causal_self_attention(x, wq, bq, wk, bk, wv, bv, wp, bp)
    out = jax.block_until_ready(out)

    ref = reference(x, wq, bq, wk, bk, wv, bv, wp, bp)
    assert out.shape == (B, T, C)
    # bf16 MXU operands + approx reciprocal -> expected abs error ~1e-4 at these magnitudes.
    assert jnp.allclose(out, ref, atol=5e-3, rtol=5e-3), "mismatch vs reference"
    print("KERNEL_OK")
</pallas_src>

<mosaic_0001>
module attributes {stable_mosaic.version = 11 : i64} {
  func.func @causal_attention_kernel(%arg0: i32, %arg1: memref<8x32xf32, #tpu.memory_space<vmem>>, %arg2: memref<32x96xbf16, #tpu.memory_space<vmem>>, %arg3: memref<1x96xf32, #tpu.memory_space<vmem>>, %arg4: memref<4x8x128xbf16, #tpu.memory_space<vmem>>, %arg5: memref<1x128xf32, #tpu.memory_space<vmem>>, %arg6: memref<8x128xf32, #tpu.memory_space<vmem>>) attributes {dimension_semantics = [#tpu.dimension_semantics<parallel>], iteration_bounds = array<i64: 2>, scalar_prefetch = 0 : i64, scratch_operands = 0 : i64, tpu.core_type = #tpu.core_type<tc>, window_params = [{transform_indices = @transform_0, window_bounds = array<i64: 8, 32>}, {pipeline_mode = #tpu.pipeline_mode<synchronous>, transform_indices = @transform_1, window_bounds = array<i64: 32, 96>}, {pipeline_mode = #tpu.pipeline_mode<synchronous>, transform_indices = @transform_2, window_bounds = array<i64: 1, 96>}, {pipeline_mode = #tpu.pipeline_mode<synchronous>, transform_indices = @transform_3, window_bounds = array<i64: 4, 8, 128>}, {pipeline_mode = #tpu.pipeline_mode<synchronous>, transform_indices = @transform_4, window_bounds = array<i64: 1, 128>}, {transform_indices = @transform_5, window_bounds = array<i64: 8, 128>}]} {
    %c0 = arith.constant 0 : index
    %c0_0 = arith.constant 0 : index
    %0 = vector.load %arg1[%c0, %c0_0] : memref<8x32xf32, #tpu.memory_space<vmem>>, vector<8x32xf32>
    %1 = arith.truncf %0 : vector<8x32xf32> to vector<8x32xbf16>
    %c0_1 = arith.constant 0 : index
    %c0_2 = arith.constant 0 : index
    %2 = vector.load %arg2[%c0_1, %c0_2] : memref<32x96xbf16, #tpu.memory_space<vmem>>, vector<32x96xbf16>
    %cst = arith.constant dense<0.000000e+00> : vector<8x96xf32>
    %3 = tpu.matmul %1, %2, %cst {dimension_numbers = #tpu.dot_dimension_numbers<[1], [0], [0], [1], [0, 0, 1, 1], [], []>} : vector<8x32xbf16>, vector<32x96xbf16>, vector<8x96xf32> -> vector<8x96xf32>
    %c0_3 = arith.constant 0 : index
    %c0_4 = arith.constant 0 : index
    %4 = vector.load %arg3[%c0_3, %c0_4] : memref<1x96xf32, #tpu.memory_space<vmem>>, vector<1x96xf32>
    %5 = vector.broadcast %4 : vector<1x96xf32> to vector<8x96xf32>
    %6 = arith.addf %3, %5 : vector<8x96xf32>
    %7 = vector.extract_strided_slice %6 {offsets = [0, 0], sizes = [8, 32], strides = [1, 1]} : vector<8x96xf32> to vector<8x32xf32>
    %8 = vector.extract_strided_slice %6 {offsets = [0, 32], sizes = [8, 32], strides = [1, 1]} : vector<8x96xf32> to vector<8x32xf32>
    %9 = vector.extract_strided_slice %6 {offsets = [0, 64], sizes = [8, 32], strides = [1, 1]} : vector<8x96xf32> to vector<8x32xf32>
    %10 = tpu.iota {dimensions = array<i32: 0>} : vector<8x8xi32>
    %11 = tpu.iota {dimensions = array<i32: 1>} : vector<8x8xi32>
    %12 = arith.cmpi sle, %11, %10 : vector<8x8xi32>
    %cst_5 = arith.constant 0.000000e+00 : f32
    %13 = vector.broadcast %cst_5 : f32 to vector<8x128xf32>
    %14 = vector.extract_strided_slice %7 {offsets = [0, 0], sizes = [8, 8], strides = [1, 1]} : vector<8x32xf32> to vector<8x8xf32>
    %15 = arith.truncf %14 : vector<8x8xf32> to vector<8x8xbf16>
    %16 = vector.extract_strided_slice %8 {offsets = [0, 0], sizes = [8, 8], strides = [1, 1]} : vector<8x32xf32> to vector<8x8xf32>
    %17 = arith.truncf %16 : vector<8x8xf32> to vector<8x8xbf16>
    %18 = vector.extract_strided_slice %9 {offsets = [0, 0], sizes = [8, 8], strides = [1, 1]} : vector<8x32xf32> to vector<8x8xf32>
    %19 = arith.truncf %18 : vector<8x8xf32> to vector<8x8xbf16>
    "tpu.trace_start"() <{level = 10 : i32, message = "td,sd->ts"}> : () -> ()
    %cst_6 = arith.constant dense<0.000000e+00> : vector<8x8xf32>
    %20 = tpu.matmul %15, %17, %cst_6 {dimension_numbers = #tpu.dot_dimension_numbers<[1], [1], [0], [0], [0, 0, 1, 0], [], []>} : vector<8x8xbf16>, vector<8x8xbf16>, vector<8x8xf32> -> vector<8x8xf32>
    "tpu.trace_stop"() : () -> ()
    %cst_7 = arith.constant 0.353553385 : f32
    %21 = vector.broadcast %cst_7 : f32 to vector<8x8xf32>
    %22 = arith.mulf %20, %21 : vector<8x8xf32>
    %cst_8 = arith.constant -1.000000e+30 : f32
    %23 = vector.broadcast %cst_8 : f32 to vector<8x8xf32>
    %24 = arith.select %12, %22, %23 : vector<8x8xi1>, vector<8x8xf32>
    %cst_9 = arith.constant dense<0xFF800000> : vector<8xf32>
    %25 = vector.multi_reduction <maximumf>, %24, %cst_9 [1] : vector<8x8xf32> to vector<8xf32>
    %26 = vector.shape_cast %25 : vector<8xf32> to vector<8x1xf32>
    %27 = vector.broadcast %26 : vector<8x1xf32> to vector<8x8xf32>
    %28 = arith.subf %24, %27 : vector<8x8xf32>
    %29 = math.exp %28 : vector<8x8xf32>
    %cst_10 = arith.constant dense<0.000000e+00> : vector<8xf32>
    %30 = vector.multi_reduction <add>, %29, %cst_10 [1] : vector<8x8xf32> to vector<8xf32>
    %31 = vector.shape_cast %30 : vector<8xf32> to vector<8x1xf32>
    %32 = tpu.reciprocal %31 {approx = true} : vector<8x1xf32> -> vector<8x1xf32>
    %33 = vector.broadcast %32 : vector<8x1xf32> to vector<8x8xf32>
    %34 = arith.mulf %29, %33 : vector<8x8xf32>
    %35 = arith.truncf %34 : vector<8x8xf32> to vector<8x8xbf16>
    %cst_11 = arith.constant dense<0.000000e+00> : vector<8x8xf32>
    %36 = tpu.matmul %35, %19, %cst_11 {dimension_numbers = #tpu.dot_dimension_numbers<[1], [0], [0], [1], [0, 0, 1, 1], [], []>} : vector<8x8xbf16>, vector<8x8xbf16>, vector<8x8xf32> -> vector<8x8xf32>
    %37 = arith.truncf %36 : vector<8x8xf32> to vector<8x8xbf16>
    %c0_12 = arith.constant 0 : index
    %c0_13 = arith.constant 0 : index
    %c0_14 = arith.constant 0 : index
    %38 = vector.load %arg4[%c0_12, %c0_13, %c0_14] : memref<4x8x128xbf16, #tpu.memory_space<vmem>>, vector<1x8x128xbf16>
    %39 = vector.shape_cast %38 : vector<1x8x128xbf16> to vector<8x128xbf16>
    %cst_15 = arith.constant dense<0.000000e+00> : vector<8x128xf32>
    %40 = tpu.matmul %37, %39, %cst_15 {dimension_numbers = #tpu.dot_dimension_numbers<[1], [0], [0], [1], [0, 0, 1, 1], [], []>} : vector<8x8xbf16>, vector<8x128xbf16>, vector<8x128xf32> -> vector<8x128xf32>
    %41 = arith.addf %13, %40 : vector<8x128xf32>
    %42 = vector.extract_strided_slice %7 {offsets = [0, 8], sizes = [8, 8], strides = [1, 1]} : vector<8x32xf32> to vector<8x8xf32>
    %43 = arith.truncf %42 : vector<8x8xf32> to vector<8x8xbf16>
    %44 = vector.extract_strided_slice %8 {offsets = [0, 8], sizes = [8, 8], strides = [1, 1]} : vector<8x32xf32> to vector<8x8xf32>
    %45 = arith.truncf %44 : vector<8x8xf32> to vector<8x8xbf16>
    %46 = vector.extract_strided_slice %9 {offsets = [0, 8], sizes = [8, 8], strides = [1, 1]} : vector<8x32xf32> to vector<8x8xf32>
    %47 = arith.truncf %46 : vector<8x8xf32> to vector<8x8xbf16>
    "tpu.trace_start"() <{level = 10 : i32, message = "td,sd->ts"}> : () -> ()
    %cst_16 = arith.constant dense<0.000000e+00> : vector<8x8xf32>
    %48 = tpu.matmul %43, %45, %cst_16 {dimension_numbers = #tpu.dot_dimension_numbers<[1], [1], [0], [0], [0, 0, 1, 0], [], []>} : vector<8x8xbf16>, vector<8x8xbf16>, vector<8x8xf32> -> vector<8x8xf32>
    "tpu.trace_stop"() : () -> ()
    %cst_17 = arith.constant 0.353553385 : f32
    %49 = vector.broadcast %cst_17 : f32 to vector<8x8xf32>
    %50 = arith.mulf %48, %49 : vector<8x8xf32>
    %cst_18 = arith.constant -1.000000e+30 : f32
    %51 = vector.broadcast %cst_18 : f32 to vector<8x8xf32>
    %52 = arith.select %12, %50, %51 : vector<8x8xi1>, vector<8x8xf32>
    %cst_19 = arith.constant dense<0xFF800000> : vector<8xf32>
    %53 = vector.multi_reduction <maximumf>, %52, %cst_19 [1] : vector<8x8xf32> to vector<8xf32>
    %54 = vector.shape_cast %53 : vector<8xf32> to vector<8x1xf32>
    %55 = vector.broadcast %54 : vector<8x1xf32> to vector<8x8xf32>
    %56 = arith.subf %52, %55 : vector<8x8xf32>
    %57 = math.exp %56 : vector<8x8xf32>
    %cst_20 = arith.constant dense<0.000000e+00> : vector<8xf32>
    %58 = vector.multi_reduction <add>, %57, %cst_20 [1] : vector<8x8xf32> to vector<8xf32>
    %59 = vector.shape_cast %58 : vector<8xf32> to vector<8x1xf32>
    %60 = tpu.reciprocal %59 {approx = true} : vector<8x1xf32> -> vector<8x1xf32>
    %61 = vector.broadcast %60 : vector<8x1xf32> to vector<8x8xf32>
    %62 = arith.mulf %57, %61 : vector<8x8xf32>
    %63 = arith.truncf %62 : vector<8x8xf32> to vector<8x8xbf16>
    %cst_21 = arith.constant dense<0.000000e+00> : vector<8x8xf32>
    %64 = tpu.matmul %63, %47, %cst_21 {dimension_numbers = #tpu.dot_dimension_numbers<[1], [0], [0], [1], [0, 0, 1, 1], [], []>} : vector<8x8xbf16>, vector<8x8xbf16>, vector<8x8xf32> -> vector<8x8xf32>
    %65 = arith.truncf %64 : vector<8x8xf32> to vector<8x8xbf16>
    %c1 = arith.constant 1 : index
    %c0_22 = arith.constant 0 : index
    %c0_23 = arith.constant 0 : index
    %66 = vector.load %arg4[%c1, %c0_22, %c0_23] : memref<4x8x128xbf16, #tpu.memory_space<vmem>>, vector<1x8x128xbf16>
    %67 = vector.shape_cast %66 : vector<1x8x128xbf16> to vector<8x128xbf16>
    %cst_24 = arith.constant dense<0.000000e+00> : vector<8x128xf32>
    %68 = tpu.matmul %65, %67, %cst_24 {dimension_numbers = #tpu.dot_dimension_numbers<[1], [0], [0], [1], [0, 0, 1, 1], [], []>} : vector<8x8xbf16>, vector<8x128xbf16>, vector<8x128xf32> -> vector<8x128xf32>
    %69 = arith.addf %41, %68 : vector<8x128xf32>
    %70 = vector.extract_strided_slice %7 {offsets = [0, 16], sizes = [8, 8], strides = [1, 1]} : vector<8x32xf32> to vector<8x8xf32>
    %71 = arith.truncf %70 : vector<8x8xf32> to vector<8x8xbf16>
    %72 = vector.extract_strided_slice %8 {offsets = [0, 16], sizes = [8, 8], strides = [1, 1]} : vector<8x32xf32> to vector<8x8xf32>
    %73 = arith.truncf %72 : vector<8x8xf32> to vector<8x8xbf16>
    %74 = vector.extract_strided_slice %9 {offsets = [0, 16], sizes = [8, 8], strides = [1, 1]} : vector<8x32xf32> to vector<8x8xf32>
    %75 = arith.truncf %74 : vector<8x8xf32> to vector<8x8xbf16>
    "tpu.trace_start"() <{level = 10 : i32, message = "td,sd->ts"}> : () -> ()
    %cst_25 = arith.constant dense<0.000000e+00> : vector<8x8xf32>
    %76 = tpu.matmul %71, %73, %cst_25 {dimension_numbers = #tpu.dot_dimension_numbers<[1], [1], [0], [0], [0, 0, 1, 0], [], []>} : vector<8x8xbf16>, vector<8x8xbf16>, vector<8x8xf32> -> vector<8x8xf32>
    "tpu.trace_stop"() : () -> ()
    %cst_26 = arith.constant 0.353553385 : f32
    %77 = vector.broadcast %cst_26 : f32 to vector<8x8xf32>
    %78 = arith.mulf %76, %77 : vector<8x8xf32>
    %cst_27 = arith.constant -1.000000e+30 : f32
    %79 = vector.broadcast %cst_27 : f32 to vector<8x8xf32>
    %80 = arith.select %12, %78, %79 : vector<8x8xi1>, vector<8x8xf32>
    %cst_28 = arith.constant dense<0xFF800000> : vector<8xf32>
    %81 = vector.multi_reduction <maximumf>, %80, %cst_28 [1] : vector<8x8xf32> to vector<8xf32>
    %82 = vector.shape_cast %81 : vector<8xf32> to vector<8x1xf32>
    %83 = vector.broadcast %82 : vector<8x1xf32> to vector<8x8xf32>
    %84 = arith.subf %80, %83 : vector<8x8xf32>
    %85 = math.exp %84 : vector<8x8xf32>
    %cst_29 = arith.constant dense<0.000000e+00> : vector<8xf32>
    %86 = vector.multi_reduction <add>, %85, %cst_29 [1] : vector<8x8xf32> to vector<8xf32>
    %87 = vector.shape_cast %86 : vector<8xf32> to vector<8x1xf32>
    %88 = tpu.reciprocal %87 {approx = true} : vector<8x1xf32> -> vector<8x1xf32>
    %89 = vector.broadcast %88 : vector<8x1xf32> to vector<8x8xf32>
    %90 = arith.mulf %85, %89 : vector<8x8xf32>
    %91 = arith.truncf %90 : vector<8x8xf32> to vector<8x8xbf16>
    %cst_30 = arith.constant dense<0.000000e+00> : vector<8x8xf32>
    %92 = tpu.matmul %91, %75, %cst_30 {dimension_numbers = #tpu.dot_dimension_numbers<[1], [0], [0], [1], [0, 0, 1, 1], [], []>} : vector<8x8xbf16>, vector<8x8xbf16>, vector<8x8xf32> -> vector<8x8xf32>
    %93 = arith.truncf %92 : vector<8x8xf32> to vector<8x8xbf16>
    %c2 = arith.constant 2 : index
    %c0_31 = arith.constant 0 : index
    %c0_32 = arith.constant 0 : index
    %94 = vector.load %arg4[%c2, %c0_31, %c0_32] : memref<4x8x128xbf16, #tpu.memory_space<vmem>>, vector<1x8x128xbf16>
    %95 = vector.shape_cast %94 : vector<1x8x128xbf16> to vector<8x128xbf16>
    %cst_33 = arith.constant dense<0.000000e+00> : vector<8x128xf32>
    %96 = tpu.matmul %93, %95, %cst_33 {dimension_numbers = #tpu.dot_dimension_numbers<[1], [0], [0], [1], [0, 0, 1, 1], [], []>} : vector<8x8xbf16>, vector<8x128xbf16>, vector<8x128xf32> -> vector<8x128xf32>
    %97 = arith.addf %69, %96 : vector<8x128xf32>
    %98 = vector.extract_strided_slice %7 {offsets = [0, 24], sizes = [8, 8], strides = [1, 1]} : vector<8x32xf32> to vector<8x8xf32>
    %99 = arith.truncf %98 : vector<8x8xf32> to vector<8x8xbf16>
    %100 = vector.extract_strided_slice %8 {offsets = [0, 24], sizes = [8, 8], strides = [1, 1]} : vector<8x32xf32> to vector<8x8xf32>
    %101 = arith.truncf %100 : vector<8x8xf32> to vector<8x8xbf16>
    %102 = vector.extract_strided_slice %9 {offsets = [0, 24], sizes = [8, 8], strides = [1, 1]} : vector<8x32xf32> to vector<8x8xf32>
    %103 = arith.truncf %102 : vector<8x8xf32> to vector<8x8xbf16>
    "tpu.trace_start"() <{level = 10 : i32, message = "td,sd->ts"}> : () -> ()
    %cst_34 = arith.constant dense<0.000000e+00> : vector<8x8xf32>
    %104 = tpu.matmul %99, %101, %cst_34 {dimension_numbers = #tpu.dot_dimension_numbers<[1], [1], [0], [0], [0, 0, 1, 0], [], []>} : vector<8x8xbf16>, vector<8x8xbf16>, vector<8x8xf32> -> vector<8x8xf32>
    "tpu.trace_stop"() : () -> ()
    %cst_35 = arith.constant 0.353553385 : f32
    %105 = vector.broadcast %cst_35 : f32 to vector<8x8xf32>
    %106 = arith.mulf %104, %105 : vector<8x8xf32>
    %cst_36 = arith.constant -1.000000e+30 : f32
    %107 = vector.broadcast %cst_36 : f32 to vector<8x8xf32>
    %108 = arith.select %12, %106, %107 : vector<8x8xi1>, vector<8x8xf32>
    %cst_37 = arith.constant dense<0xFF800000> : vector<8xf32>
    %109 = vector.multi_reduction <maximumf>, %108, %cst_37 [1] : vector<8x8xf32> to vector<8xf32>
    %110 = vector.shape_cast %109 : vector<8xf32> to vector<8x1xf32>
    %111 = vector.broadcast %110 : vector<8x1xf32> to vector<8x8xf32>
    %112 = arith.subf %108, %111 : vector<8x8xf32>
    %113 = math.exp %112 : vector<8x8xf32>
    %cst_38 = arith.constant dense<0.000000e+00> : vector<8xf32>
    %114 = vector.multi_reduction <add>, %113, %cst_38 [1] : vector<8x8xf32> to vector<8xf32>
    %115 = vector.shape_cast %114 : vector<8xf32> to vector<8x1xf32>
    %116 = tpu.reciprocal %115 {approx = true} : vector<8x1xf32> -> vector<8x1xf32>
    %117 = vector.broadcast %116 : vector<8x1xf32> to vector<8x8xf32>
    %118 = arith.mulf %113, %117 : vector<8x8xf32>
    %119 = arith.truncf %118 : vector<8x8xf32> to vector<8x8xbf16>
    %cst_39 = arith.constant dense<0.000000e+00> : vector<8x8xf32>
    %120 = tpu.matmul %119, %103, %cst_39 {dimension_numbers = #tpu.dot_dimension_numbers<[1], [0], [0], [1], [0, 0, 1, 1], [], []>} : vector<8x8xbf16>, vector<8x8xbf16>, vector<8x8xf32> -> vector<8x8xf32>
    %121 = arith.truncf %120 : vector<8x8xf32> to vector<8x8xbf16>
    %c3 = arith.constant 3 : index
    %c0_40 = arith.constant 0 : index
    %c0_41 = arith.constant 0 : index
    %122 = vector.load %arg4[%c3, %c0_40, %c0_41] : memref<4x8x128xbf16, #tpu.memory_space<vmem>>, vector<1x8x128xbf16>
    %123 = vector.shape_cast %122 : vector<1x8x128xbf16> to vector<8x128xbf16>
    %cst_42 = arith.constant dense<0.000000e+00> : vector<8x128xf32>
    %124 = tpu.matmul %121, %123, %cst_42 {dimension_numbers = #tpu.dot_dimension_numbers<[1], [0], [0], [1], [0, 0, 1, 1], [], []>} : vector<8x8xbf16>, vector<8x128xbf16>, vector<8x128xf32> -> vector<8x128xf32>
    %125 = arith.addf %97, %124 : vector<8x128xf32>
    %c0_43 = arith.constant 0 : index
    %c0_44 = arith.constant 0 : index
    %126 = vector.load %arg5[%c0_43, %c0_44] : memref<1x128xf32, #tpu.memory_space<vmem>>, vector<1x128xf32>
    %127 = vector.broadcast %126 : vector<1x128xf32> to vector<8x128xf32>
    %128 = arith.addf %125, %127 : vector<8x128xf32>
    %c0_45 = arith.constant 0 : index
    %c0_46 = arith.constant 0 : index
    %129 = vector.load %arg6[%c0_45, %c0_46] : memref<8x128xf32, #tpu.memory_space<vmem>>, vector<8x128xf32>
    tpu.vector_store %arg6[%c0_45, %c0_46], %128 {strides = array<i32>} : memref<8x128xf32, #tpu.memory_space<vmem>>, vector<8x128xf32>,
    return
  }
  func.func @transform_0(%arg0: i32) -> (i32, i32) {
    %c0_i32 = arith.constant 0 : i32
    %c0_i32_0 = arith.constant 0 : i32
    return %arg0, %c0_i32 : i32, i32
  }
  func.func @transform_1(%arg0: i32) -> (i32, i32) {
    %c0_i32 = arith.constant 0 : i32
    %c0_i32_0 = arith.constant 0 : i32
    %c0_i32_1 = arith.constant 0 : i32
    return %c0_i32, %c0_i32_0 : i32, i32
  }
  func.func @transform_2(%arg0: i32) -> (i32, i32) {
    %c0_i32 = arith.constant 0 : i32
    %c0_i32_0 = arith.constant 0 : i32
    %c0_i32_1 = arith.constant 0 : i32
    return %c0_i32, %c0_i32_0 : i32, i32
  }
  func.func @transform_3(%arg0: i32) -> (i32, i32, i32) {
    %c0_i32 = arith.constant 0 : i32
    %c0_i32_0 = arith.constant 0 : i32
    %c0_i32_1 = arith.constant 0 : i32
    %c0_i32_2 = arith.constant 0 : i32
    return %c0_i32, %c0_i32_0, %c0_i32_1 : i32, i32, i32
  }
  func.func @transform_4(%arg0: i32) -> (i32, i32) {
    %c0_i32 = arith.constant 0 : i32
    %c0_i32_0 = arith.constant 0 : i32
    %c0_i32_1 = arith.constant 0 : i32
    return %c0_i32, %c0_i32_0 : i32, i32
  }
  func.func @transform_5(%arg0: i32) -> (i32, i32) {
    %c0_i32 = arith.constant 0 : i32
    %c0_i32_0 = arith.constant 0 : i32
    return %arg0, %c0_i32 : i32, i32
  }
}

</mosaic_0001>

<bundles_post_ra>
// kernel: tpu_custom_call.1
= control target key start
LH: loop header
LB: loop body
LE: loop exit
PB: predicated region body
PF: predicated region fallthrough
CT: control target
= control target key end

     0   :  { %10 = vsyncpa [#allocation3], 0  ;;  %s1896_s0 = inlined_call_operand.hbm [shape: f32[16,32], index: 0, kind: input, shape index: {}]   ;;  %s1897_s1 = inlined_call_operand.hbm [shape: bf16[32,96], index: 1, kind: input, shape index: {}]   ;;  %s1898_s2 = inlined_call_operand.vmem [shape: f32[1,96], index: 2, kind: input, shape index: {}]   ;;  %s1899_s3 = inlined_call_operand.hbm [shape: bf16[4,8,128], index: 3, kind: input, shape index: {}]   ;;  %s1900_s4 = inlined_call_operand.vmem [shape: f32[1,128], index: 4, kind: input, shape index: {}]   ;;  %s1901_s5 = inlined_call_operand.hbm [shape: f32[16,128], index: 5, kind: output, shape index: {}]  }
   0x1   :  { %12 = vsyncpa [#allocation3 + $0x1], 0 }
   0x2   :  { %13 = vsyncpa [#allocation6], 0 }
   0x3   :  { %14 = vsyncpa [#allocation4], 0 }
   0x4   :  { %16 = vsyncpa [#allocation4 + $0x1], 0  ;;  %s1550_s18 = smov 0   ;;  %s1552_s19 = smov 0  }
   0x5   :  { %s1554_s20 = smov 0   ;;  %s1556_s21 = smov 0  }
   0x6 LB: > { %s1571_s22 = sadd.s32 4294967295, %s1499_s21   ;;  %s1103_s23 = sadd.s32 4294967294, %s1499_s21   ;;  %s1499_s21 = sphi %s1556_s21, %s1921_s21   ;;  %s1495_s20 = sphi %s1554_s20, %s1920_s20   ;;  %s1491_s19 = sphi %s1552_s19, %s1919_s19   ;;  %s1487_s18 = sphi %s1550_s18, %s1918_s18  }
   0x7   : > { %p42_p0 = scmp.ne.s32.totalorder %s1491_s19, %s1487_s18  ;;  %p1902_p1 = scmp.eq.s32.totalorder %s1571_s22, 0 }
   0x8   : > { %p156_p3 = scmp.eq.s32.totalorder %s1103_s23, 1  ;;  %p1104_p5 = scmp.ge.s32.totalorder %s1499_s21, 1 }
   0x9   : > { %p1580_p4 = por %p1902_p1, %p42_p0  ;;  %p163_p7 = scmp.lt.s32.totalorder %s1499_s21, 3 }
   0xa   : > { %p1585_p6 = por %p156_p3, %p42_p0  ;;  %s1501_s27 = smov [#allocation5]  }
   0xb   : > { %s1905_s24 = scalar_select %p1580_p4, 1, 0 }
   0xc   : > { %s1906_s25 = scalar_select %p1585_p6, 1, 0 }
   0xd   : > { %p1590_p8 = pnand %p1104_p5, %p163_p7  ;;  %s175_s28 = sshll.u32 %s1501_s27, 4  ;;  %s1594_s28 = int_to_ptr.vmem [resolvable:$true] %s175_s28 }
   0xe   : > { %s1502_s30 = smov [#allocation7]   ;;  %s1343_s9 = scalar_lea.hbm %s1897_s1, 256 }
   0xf   : > { %p1255_p9 = pneg %p1590_p8  ;;  %s191_s6 = sshll.u32 %s1502_s30, 4  ;;  %s1605_s6 = int_to_ptr.vmem [resolvable:$true] %s191_s6 }
  0x10   : > { %p1344_p12 = scmp.ne.s32.totalorder %s1897_s1, %s1343_s9  ;;  %p1350_p5 = scmp.lt.u32.totalorder %s1343_s9, %s1897_s1 }
  0x11   : > { %p1601_p11 = pnand %p1255_p9, %p1902_p1 }
  0x13   : > { %p1345_p13 = pneg %p1601_p11 }
  0x15   : > { %p1346_p0 = pnand %p1345_p13, %p1344_p12 }
  0x17   : > { %p1347_p3 = pneg %p1346_p0 }
  0x19   : > { %p1352_p7 = pnand %p1350_p5, %p1347_p3 }
  0x1b   : > { %1355 = shalt.err (!%p1352_p7)
}
  0x1c   : > { %s1356_s14 = scalar_lea.vmem %s1594_s28, 256  ;;  %p1364_p2 = scmp.lt.s32.totalorder %s1594_s28, %s1594_s28 }
  0x1d   : > { %p1357_p9 = scmp.ne.s32.totalorder %s1594_s28, %s1356_s14  ;;  %p1365_p12 = scmp.lt.s32.totalorder %s1356_s14, %s1356_s14 }
  0x1f   : > { %p1359_p10 = pnand %p1357_p9, %p1345_p13  ;;  %p1366_p0 = por %p1365_p12, %p1364_p2 }
  0x21   : > { %p1360_p1 = pneg %p1359_p10 }
  0x23   : > { %p1367_p6 = pnand %p1366_p0, %p1360_p1 }
  0x25   : > { %1370 = shalt.err (!%p1367_p6)
}
  0x26   : > { %s1503_s15 = smov 64   ;;  %s1504_s16 = smov 4  }
  0x27   : > { %1258 = dma.hbm_to_vmem [thread:$0]  (!%p1601_p11), %s1897_s1, 256, %s1594_s28, [#allocation6], %s1503_s15, %s1503_s15, %s1504_s16  }
  0x28   : > { %s1371_s7 = scalar_lea.hbm %s1899_s3, 256 }
  0x29   : > { %p1372_p2 = scmp.ne.s32.totalorder %s1899_s3, %s1371_s7  ;;  %p1378_p10 = scmp.lt.u32.totalorder %s1371_s7, %s1899_s3 }
  0x2b   : > { %p1374_p1 = pnand %p1372_p2, %p1345_p13 }
  0x2d   : > { %p1375_p6 = pneg %p1374_p1 }
  0x2f   : > { %p1380_p3 = pnand %p1378_p10, %p1375_p6 }
  0x31   : > { %1383 = shalt.err (!%p1380_p3)
}
  0x32   : > { %s1384_s28 = scalar_lea.vmem %s1605_s6, 256  ;;  %p1392_p12 = scmp.lt.s32.totalorder %s1605_s6, %s1605_s6 }
  0x33   : > { %p1385_p5 = scmp.ne.s32.totalorder %s1605_s6, %s1384_s28  ;;  %p1393_p0 = scmp.lt.s32.totalorder %s1384_s28, %s1384_s28 }
  0x35   : > { %p1387_p7 = pnand %p1385_p5, %p1345_p13  ;;  %p1394_p2 = por %p1393_p0, %p1392_p12 }
  0x37   : > { %p1388_p9 = pneg %p1387_p7 }
  0x39   : > { %p1395_p1 = pnand %p1394_p2, %p1388_p9 }
  0x3b   : > { %1398 = shalt.err (!%p1395_p1)
}
  0x3c   : > { %1261 = dma.hbm_to_vmem [thread:$0]  (!%p1601_p11), %s1899_s3, 256, %s1605_s6, [#allocation6], %s1503_s15, %s1503_s15, %s1504_s16  }
  0x3d   : > { %s1660_s14 = sadd.s32 1, %s1499_s21   ;;  %s29_s29 = sadd.s32 1, %s1495_s20 }
  0x3e   : > { %s26_s17 = ssub.s32 %s1499_s21, %s1660_s14  ;;  %p36_p13 = scmp.ne.s32.totalorder %s1495_s20, %s1491_s19 }
  0x3f   : > { %p27_p6 = scmp.eq.s32.totalorder %s26_s17, 0  ;;  %p37_p10 = scmp.eq.s32.totalorder %s1499_s21, 0 }
  0x40   : > { %p1909_p3 = scmp.eq.s32.totalorder %s1571_s22, 1  ;;  %p1272_p7 = scmp.lt.s32.totalorder %s1499_s21, 2 }
  0x41   : > { %s1676_s27 = scalar_select %p27_p6, %s1495_s20, %s29_s29  }
  0x42   : > { %p1670_p5 = por %p1909_p3, %p36_p13  ;;  %p38_p9 = por %p37_p10, %p36_p13 }
  0x43   : > { %s208_s30 = sand.u32 1, %s1495_s20   ;;  %s1109_s6 = sshll.u32 %s1499_s21, 7 }
  0x44   : > { %s1910_s23 = scalar_select %p1670_p5, 1, 0 }
  0x45   : > { %s1108_s7 = sshll.u32 %s208_s30, 3  ;;  %s1683_s8 = scalar_lea.hbm %s1896_s0, %s1109_s6 }
  0x46   : > { %s212_s9 = scalar_lea.vmem [#allocation2], %s1108_s7  ;;  %p1687_p11 = pnand %p1272_p7, %p38_p9 }
  0x47   : > { %s219_s10 = sshll.u32 %s212_s9, 4  ;;  %s209_s28 = scalar_lea.sflag [#allocation3], %s208_s30  ;;  %s1685_s10 = int_to_ptr.vmem [resolvable:$true] %s219_s10 }
  0x48   : > { %s1399_s12 = scalar_lea.hbm %s1683_s8, 128  ;;  %p1401_p0 = pneg %p1687_p11 }
  0x49   : > { %p1400_p12 = scmp.ne.s32.totalorder %s1683_s8, %s1399_s12  ;;  %s1404_s17 = scalar_lea.hbm %s1896_s0, 256 }
  0x4a   : > { %p1405_p13 = scmp.lt.u32.totalorder %s1683_s8, %s1896_s0  ;;  %p1406_p6 = scmp.lt.u32.totalorder %s1404_s17, %s1399_s12 }
  0x4b   : > { %p1402_p2 = pnand %p1401_p0, %p1400_p12  ;;  %p1408_p3 = scmp.lt.u32.totalorder %s1399_s12, %s1683_s8 }
  0x4c   : > { %p1407_p10 = por %p1406_p6, %p1405_p13 }
  0x4d   : > { %p1403_p1 = pneg %p1402_p2 }
  0x4e   : > { %p1409_p7 = por %p1408_p3, %p1407_p10 }
  0x50   : > { %p1410_p9 = pnand %p1409_p7, %p1403_p1 }
  0x52   : > { %1413 = shalt.err (!%p1410_p9)
}
  0x53   : > { %s1414_s30 = scalar_lea.vmem %s1685_s10, 128  ;;  %s1505_s15 = smov [#allocation2]  }
  0x54   : > { %p1415_p12 = scmp.ne.s32.totalorder %s1685_s10, %s1414_s30  ;;  %s1419_s16 = sshll.u32 %s1505_s15, 4  ;;  %s1420_s16 = int_to_ptr.vmem [resolvable:$false] %s1419_s16 }
  0x55   : > { %s1421_s9 = scalar_lea.vmem %s1420_s16, 256  ;;  %p1422_p4 = scmp.lt.s32.totalorder %s1685_s10, %s1420_s16 }
  0x56   : > { %p1417_p2 = pnand %p1415_p12, %p1401_p0  ;;  %p1423_p13 = scmp.lt.s32.totalorder %s1421_s9, %s1414_s30 }
  0x58   : > { %p1418_p5 = pneg %p1417_p2  ;;  %p1424_p6 = por %p1423_p13, %p1422_p4 }
  0x5a   : > { %p1425_p10 = pnand %p1424_p6, %p1418_p5 }
  0x5c   : > { %1428 = shalt.err (!%p1425_p10)
}
  0x5d   : > { %1265 = dma.hbm_to_vmem [thread:$0]  (!%p1687_p11), %s1683_s8, 128, %s1685_s10, %s209_s28  }
  0x5e   : > { %228 = sbr.rel (%p1590_p8) target bundleno = 2729 (0xaa9), region = 40  ;;  %s1719_s12 = sand.u32 (!%p1590_p8), 1, %s1491_s19  }
  0x5f   : > { %s1111_s13 = sshll.u32 (!%p1590_p8), %s1719_s12, 3  ;;  %s231_s29 = scalar_lea.sflag (!%p1590_p8), [#allocation3], %s1719_s12 }
  0x60   : > { %s234_s17 = scalar_lea.vmem (!%p1590_p8), [#allocation2], %s1111_s13  ;;  %p1912_p4 = scmp.ne.s32.totalorder (!%p1590_p8), %s1905_s24, 0 }
  0x65   : > { %1474 = dma.done.wait (%p1912_p4), %s231_s29, 128  }
  0x66   : > { %1476 = vsyncadd (%p1912_p4), %s231_s29, 4294967168  ;;  %p1913_p5 = scmp.eq.s32.totalorder %s1571_s22, 0 }
  0x68   : > { %1478 = dma.done.wait (%p1913_p5), [#allocation6], 512   ;;  %p1914_p8 = pmov %p1913_p5 }
  0x69   : > { %v1506_v0 = vmov 0.0   ;;  %vm1507_vm0 = vmmov 0   ;;  %v1325_v1 = vld [vmem:[#allocation5] sm:$0xff]   ;;  %v1326_v2 = vld [vmem:[#allocation5 + $0x8] sm:$0xff]   ;;  %v270_v3 = vld [vmem:[%s234_s17] sm:$0xff]  ;;  %vm295_vm1 = vcmask 261120   ;;  %v339_v17 = vlaneseq }
  0x6a   : > { %1480 = vsyncadd (%p1914_p8), [#allocation6], 4294966784  ;;  %1163 = vmatprep.subr.bf16.mxu0 %v1506_v0  ;;  %1167 = vmatprep.mubr.msk.bf16.mxu0 %vm1507_vm0, %v1506_v0  ;;  %v271_v4 = vpack.c.bf16 %v270_v3, %v270_v3  ;;  %v1115_v5 = vld [vmem:[%s1898_s2] ss:$0 sm:$0xff]  ;;  %s1508_s8 = smov 120   ;;  %s1509_s10 = smov 96  }
  0x6b   : > { %1171 = vmatprep.subr.bf16.mxu1 %v1506_v0  ;;  %1173 = vmatprep.mubr.msk.bf16.mxu1 %vm1507_vm0, %v1506_v0  ;;  %s1510_s11 = smov 88   ;;  %vm348_vm2 = vcmask 64512   ;;  %v1762_v18 = vshrl.u32 %v339_v17, 7  ;;  %v1764_v19 = vand.u32 127, %v339_v17  ;;  %s1511_s28 = smov 64   ;;  %vm414_vm4 = vcmask 1043456  }
  0x6c   : > { %1164 = vmatpush3.bf16.msra.mxu0 %v1325_v1  ;;  %s1512_s7 = smov 56   ;;  %s1513_s6 = smov 112   ;;  %v459_v56 = vld [vmem:[#allocation7] sm:$0xf]  ;;  %v574_v58 = vld [vmem:[#allocation7 + $0x4] sm:$0xf] }
  0x6d   : > { %1165 = vmatprep.subr.bf16.mxu0 %v1506_v0  ;;  %vm343_vm3 = vcmp.le.s32.totalorder %v1764_v19, %v1762_v18  ;;  %s1514_s30 = smov 80   ;;  %v625_v57 = vsel %vm414_vm4, %v459_v56, 0  ;;  %v579_v59 = vsel %vm414_vm4, %v574_v58, 0  ;;  %s1515_s15 = smov 72   ;;  %v943_v18 = vld [vmem:[#allocation7 + $0xc] sm:$0xf] }
  0x6e   : > { %s1516_s16 = smov 104   ;;  %s1517_s9 = smov 48   ;;  %v948_v19 = vsel %vm414_vm4, %v943_v18, 0 }
  0x6f   : > { %s1518_s29 = smov 40   ;;  %s1133_s26 = sshll.u32 %s1571_s22, 7 }
  0x70   : > { %1166 = vmatpush3.bf16.msra.mxu0 %v1326_v2  ;;  %s1001_s22 = scalar_lea.sflag [#allocation4], %s1719_s12  ;;  %p1915_p0 = scmp.ne.s32.totalorder %s1910_s23, 0 }
  0x71   : > { %1177 = vmatprep.subr.bf16.mxu0 %v1506_v0 }
  0x73   : > { %1168 = vmatmul.mubr.msk.bf16.vlgmr.msra.gmra.mrb[0].mxu0 %vm295_vm1, %v271_v4 }
  0x74   : > { %1179 = vmatprep.mubr.msk.bf16.mxu0 %vm1507_vm0, %v1506_v0 }
 0x146   : > { %v333_v6 = vpop.f32.mrb[0].mxu0 }
 0x147   : > { %v334_v7 = vadd.f32 %v1115_v5, %v333_v6  ;;  %v1169_v8 = vpop.f32.mrb[1].mxu0 }
 0x148   : > { %v336_v9 = vpop.f32.mrb[2].mxu0 }
 0x149   : > { %v1746_v10 = vpack.c.bf16 %v334_v7, %v334_v7  ;;  %v1170_v11 = vpop.f32.mrb[3].mxu0 }
 0x14b   : > { %460 = vrot.lane.b32.xlu1 %v1746_v10, %s1508_s8  ;;  %346 = vrot.lane.b32.xlu0 %v1746_v10, %s1509_s10  ;;  %s268_s8 = scalar_lea.vmem [#allocation8], %s1111_s13  ;;  %s1519_s13 = smov [#allocation8]  }
 0x14c   : > { %s1014_s10 = sshll.u32 %s268_s8, 4  ;;  %s1854_s10 = int_to_ptr.vmem [resolvable:$true] %s1014_s10 }
 0x14f   : > { %462 = vrot.lane.b32.xlu0 %v1746_v10, %s1510_s11 }
 0x1bd   : > { %v347_v12 = vpop.permute.xlu0 %346  ;;  %v461_v16 = vpop.permute.xlu1 %460 }
 0x1be   : > { %v353_v13 = vsel %vm348_vm2, %v347_v12, 0 }
 0x1bf   : > { %1172 = vmatpush3.bf16.xpose.msra.mxu1 %v353_v13 }
 0x1c0   : > { %1183 = vmatprep.subr.bf16.mxu1 %v1506_v0 }
 0x1c1   : > { %v463_v14 = vpop.permute.xlu0 %462 }
 0x1c2   : > { %v468_v15 = vsel %vm348_vm2, %v463_v14, 0 }
 0x1c6   : > { %1174 = vmatmul.mubr.msk.bf16.vlgmr.msra.gmra.mrb[0].mxu1 %vm348_vm2, %v1746_v10 }
 0x1c7   : > { %1184 = vmatpush3.bf16.xpose.msra.mxu1 %v468_v15  ;;  %1185 = vmatprep.mubr.msk.bf16.mxu1 %vm1507_vm0, %v1506_v0 }
 0x1c8   : > { %1195 = vmatprep.subr.bf16.mxu1 %v1506_v0 }
 0x1ce   : > { %1186 = vmatmul.mubr.msk.bf16.vlgmr.msra.gmra.mrb[4].mxu1 %vm348_vm2, %v461_v16 }
 0x1cf   : > { %1197 = vmatprep.mubr.msk.bf16.mxu1 %vm1507_vm0, %v1506_v0  ;;  %1196 = vmatpush3.bf16.msra.mxu1 %v579_v59 }
 0x1d0   : > { %1207 = vmatprep.subr.bf16.mxu1 %v1506_v0 }
 0x299   : > { %v389_v20 = vpop.f32.mrb[0].mxu1 }
 0x29a   : > { %v395_v21 = vmul.f32 0.35355338, %v389_v20  ;;  %v1175_v22 = vpop.f32.mrb[1].mxu1 }
 0x29b   : > { %v392_v23 = vpop.f32.mrb[2].mxu1 }
 0x29c   : > { %v1176_v24 = vpop.f32.mrb[3].mxu1  ;;  %v396_v25 = vsel %vm343_vm3, %v395_v21, -1e+30 }
 0x29d   : > { %v397_v26 = vsel %vm348_vm2, %v396_v25, -inf }
 0x29e   : > { %398 = vmax.xlane.f32.xlu1 %v397_v26 }
 0x2a1   : > { %v504_v27 = vpop.f32.mrb[4].mxu1 }
 0x2a2   : > { %v510_v28 = vmul.f32 0.35355338, %v504_v27  ;;  %v1187_v29 = vpop.f32.mrb[5].mxu1 }
 0x2a3   : > { %v507_v30 = vpop.f32.mrb[6].mxu1 }
 0x2a4   : > { %v1188_v31 = vpop.f32.mrb[7].mxu1  ;;  %v511_v32 = vsel %vm343_vm3, %v510_v28, -1e+30 }
 0x2a5   : > { %v512_v33 = vsel %vm348_vm2, %v511_v32, -inf }
 0x2a6   : > { %513 = vmax.xlane.f32.xlu0 %v512_v33 }
 0x32b   : > { %v399_v34 = vpop.xlane.xlu1 %398 }
 0x32c   : > { %v400_v35 = vsub.f32 %v396_v25, %v399_v34 }
 0x32e   : > { %v401_v36 = vmul.f32 1.442695, %v400_v35 }
 0x330   : > { %1327 = vpow2.f32 %v401_v36 }
 0x333   : > { %v514_v37 = vpop.xlane.xlu0 %513 }
 0x334   : > { %v515_v38 = vsub.f32 %v511_v32, %v514_v37 }
 0x336   : > { %v516_v39 = vmul.f32 1.442695, %v515_v38 }
 0x338   : > { %1329 = vpow2.f32 %v516_v39 }
 0x33a   : > { %v1328_v40 = vpop.eup %1327 }
 0x33b   : > { %v403_v41 = vsel %vm348_vm2, %v1328_v40, 0.0 }
 0x33c   : > { %404 = vadd.xlane.f32.xlu0 %v403_v41 }
 0x342   : > { %v1330_v42 = vpop.eup %1329 }
 0x343   : > { %v518_v43 = vsel %vm348_vm2, %v1330_v42, 0.0 }
 0x344   : > { %519 = vadd.xlane.f32.xlu1 %v518_v43  ;;  %v781_v43 = vld [vmem:[#allocation7 + $0x8] sm:$0xf] }
 0x352   : > { %409 = vrot.lane.b32.xlu0 %v1746_v10, %s1511_s28 }
 0x355   : > { %524 = vrot.lane.b32.xlu1 %v1746_v10, %s1512_s7  ;;  %s1852_s7 = scalar_lea.hbm %s1901_s5, %s1133_s26 }
 0x356   : > { %667 = vrot.lane.b32.xlu0 %v1746_v10, %s1513_s6  ;;  %s1429_s6 = scalar_lea.vmem %s1854_s10, 128 }
 0x357   : > { %p1430_p11 = scmp.ne.s32.totalorder %s1854_s10, %s1429_s6 }
 0x359   : > { %669 = vrot.lane.b32.xlu1 %v1746_v10, %s1514_s30  ;;  %p1431_p1 = pnand %p1430_p11, %p1915_p0  ;;  %s1433_s30 = sshll.u32 %s1519_s13, 4  ;;  %s1434_s30 = int_to_ptr.vmem [resolvable:$false] %s1433_s30 }
 0x35a   : > { %p1436_p7 = scmp.lt.s32.totalorder %s1854_s10, %s1434_s30 }
 0x35b   : > { %p1432_p3 = pneg %p1431_p1 }
 0x3c9   : > { %v405_v44 = vpop.xlane.xlu0 %404 }
 0x3ca   : > { %1331 = vrcp.f32 %v405_v44  ;;  %v786_v44 = vsel %vm414_vm4, %v781_v43, 0 }
 0x3cd   : > { %v410_v45 = vpop.permute.xlu0 %409 }
 0x3ce   : > { %v416_v46 = vsel %vm414_vm4, %v410_v45, 0 }
 0x3cf   : > { %1178 = vmatpush3.bf16.msra.mxu0 %v416_v46 }
 0x3d0   : > { %1189 = vmatprep.subr.bf16.mxu0 %v1506_v0 }
 0x3d1   : > { %v520_v47 = vpop.xlane.xlu1 %519  ;;  %v668_v9 = vpop.permute.xlu0 %667 }
 0x3d2   : > { %1333 = vrcp.f32 %v520_v47 }
 0x3d4   : > { %v1332_v48 = vpop.eup %1331 }
 0x3d5   : > { %v407_v49 = vmul.f32 %v1332_v48, %v1328_v40  ;;  %v525_v50 = vpop.permute.xlu1 %524 }
 0x3d6   : > { %v530_v52 = vsel %vm414_vm4, %v525_v50, 0 }
 0x3d7   : > { %v408_v51 = vpack.c.bf16 %v407_v49, %v407_v49 }
 0x3d9   : > { %1180 = vmatmul.mubr.msk.bf16.vlgmr.msra.gmra.mrb[4].mxu0 %vm348_vm2, %v408_v51  ;;  %v670_v2 = vpop.permute.xlu1 %669 }
 0x3da   : > { %1190 = vmatpush3.bf16.msra.mxu0 %v530_v52  ;;  %1191 = vmatprep.mubr.msk.bf16.mxu0 %vm1507_vm0, %v1506_v0  ;;  %v675_v7 = vsel %vm348_vm2, %v670_v2, 0 }
 0x3db   : > { %1201 = vmatprep.subr.bf16.mxu0 %v1506_v0 }
 0x3dc   : > { %v1334_v53 = vpop.eup %1333 }
 0x3dd   : > { %v522_v54 = vmul.f32 %v1334_v53, %v1330_v42 }
 0x3df   : > { %v523_v55 = vpack.c.bf16 %v522_v54, %v522_v54 }
 0x3e1   : > { %1192 = vmatmul.mubr.msk.bf16.vlgmr.msra.gmra.mrb[8].mxu0 %vm348_vm2, %v523_v55 }
 0x3e2   : > { %1203 = vmatprep.mubr.msk.bf16.mxu0 %vm1507_vm0, %v1506_v0  ;;  %1202 = vmatpush3.bf16.msra.mxu0 %v625_v57 }
 0x3e3   : > { %1213 = vmatprep.subr.bf16.mxu0 %v1506_v0 }
 0x4ac   : > { %v452_v60 = vpop.f32.mrb[4].mxu0 }
 0x4ad   : > { %v458_v61 = vpack.c.bf16 %v452_v60, %v452_v60  ;;  %v1181_v62 = vpop.f32.mrb[5].mxu0 }
 0x4ae   : > { %v455_v63 = vpop.f32.mrb[6].mxu0 }
 0x4af   : > { %v1182_v1 = vpop.f32.mrb[7].mxu0  ;;  %1204 = vmatmul.mubr.msk.bf16.vlgmr.msra.gmra.mrb[12].mxu0 %vm348_vm2, %v458_v61 }
 0x4b0   : > { %1215 = vmatprep.mubr.msk.bf16.mxu0 %vm1507_vm0, %v1506_v0 }
 0x4b4   : > { %v566_v3 = vpop.f32.mrb[8].mxu0 }
 0x4b5   : > { %v572_v4 = vpack.c.bf16 %v566_v3, %v566_v3  ;;  %v1193_v5 = vpop.f32.mrb[9].mxu0 }
 0x4b6   : > { %v569_v6 = vpop.f32.mrb[10].mxu0 }
 0x4b7   : > { %v1194_v8 = vpop.f32.mrb[11].mxu0  ;;  %1198 = vmatmul.mubr.msk.bf16.vlgmr.msra.gmra.mrb[8].mxu1 %vm348_vm2, %v572_v4 }
 0x4b8   : > { %1208 = vmatpush3.bf16.xpose.msra.mxu1 %v675_v7  ;;  %1209 = vmatprep.mubr.msk.bf16.mxu1 %vm1507_vm0, %v1506_v0 }
 0x4b9   : > { %1219 = vmatprep.subr.bf16.mxu1 %v1506_v0 }
 0x4bf   : > { %1210 = vmatmul.mubr.msk.bf16.vlgmr.msra.gmra.mrb[12].mxu1 %vm348_vm2, %v668_v9 }
 0x4c0   : > { %1221 = vmatprep.mubr.msk.bf16.mxu1 %vm1507_vm0, %v1506_v0  ;;  %1220 = vmatpush3.bf16.msra.mxu1 %v786_v44 }
 0x4c1   : > { %1231 = vmatprep.subr.bf16.mxu1 %v1506_v0 }
 0x582   : > { %v661_v11 = vpop.f32.mrb[12].mxu0 }
 0x583   : > { %v1205_v12 = vpop.f32.mrb[13].mxu0 }
 0x584   : > { %v664_v13 = vpop.f32.mrb[14].mxu0 }
 0x585   : > { %v1206_v14 = vpop.f32.mrb[15].mxu0 }
 0x58a   : > { %v615_v15 = vpop.f32.mrb[8].mxu1 }
 0x58b   : > { %v1807_v16 = vadd.f32 %v661_v11, %v615_v15  ;;  %v1199_v17 = vpop.f32.mrb[9].mxu1  ;;  %v1131_v15 = vld [vmem:[%s1900_s4] ss:$0 sm:$0xff] }
 0x58c   : > { %v618_v20 = vpop.f32.mrb[10].mxu1 }
 0x58d   : > { %v1200_v21 = vpop.f32.mrb[11].mxu1 }
 0x592   : > { %v711_v22 = vpop.f32.mrb[12].mxu1 }
 0x593   : > { %v717_v23 = vmul.f32 0.35355338, %v711_v22  ;;  %v1211_v24 = vpop.f32.mrb[13].mxu1 }
 0x594   : > { %v714_v25 = vpop.f32.mrb[14].mxu1 }
 0x595   : > { %v1212_v26 = vpop.f32.mrb[15].mxu1  ;;  %v718_v27 = vsel %vm343_vm3, %v717_v23, -1e+30 }
 0x596   : > { %v719_v28 = vsel %vm348_vm2, %v718_v27, -inf }
 0x597   : > { %720 = vmax.xlane.f32.xlu1 %v719_v28 }
 0x5a8   : > { %831 = vrot.lane.b32.xlu1 %v1746_v10, %s1515_s15  ;;  %s1435_s15 = scalar_lea.vmem %s1434_s30, 256 }
 0x5a9   : > { %p1437_p9 = scmp.lt.s32.totalorder %s1435_s15, %s1429_s6 }
 0x5ab   : > { %p1438_p12 = por %p1437_p9, %p1436_p7 }
 0x5ac   : > { %829 = vrot.lane.b32.xlu1 %v1746_v10, %s1516_s16 }
 0x5ad   : > { %p1439_p2 = pnand %p1438_p12, %p1432_p3 }
 0x624   : > { %v721_v29 = vpop.xlane.xlu1 %720 }
 0x625   : > { %v722_v30 = vsub.f32 %v718_v27, %v721_v29 }
 0x627   : > { %v723_v31 = vmul.f32 1.442695, %v722_v30 }
 0x628   : > { %v832_v39 = vpop.permute.xlu1 %831 }
 0x629   : > { %1335 = vpow2.f32 %v723_v31  ;;  %v837_v41 = vsel %vm348_vm2, %v832_v39, 0 }
 0x62c   : > { %v830_v42 = vpop.permute.xlu1 %829 }
 0x633   : > { %v1336_v32 = vpop.eup %1335 }
 0x634   : > { %v725_v33 = vsel %vm348_vm2, %v1336_v32, 0.0 }
 0x635   : > { %726 = vadd.xlane.f32.xlu0 %v725_v33 }
 0x64b   : > { %731 = vrot.lane.b32.xlu0 %v1746_v10, %s1517_s9 }
 0x6c2   : > { %v727_v34 = vpop.xlane.xlu0 %726 }
 0x6c3   : > { %1337 = vrcp.f32 %v727_v34 }
 0x6c6   : > { %v732_v35 = vpop.permute.xlu0 %731 }
 0x6c7   : > { %v737_v36 = vsel %vm414_vm4, %v732_v35, 0 }
 0x6c8   : > { %1214 = vmatpush3.bf16.msra.mxu0 %v737_v36 }
 0x6c9   : > { %1225 = vmatprep.subr.bf16.mxu0 %v1506_v0 }
 0x6cd   : > { %v1338_v37 = vpop.eup %1337 }
 0x6ce   : > { %v729_v38 = vmul.f32 %v1338_v37, %v1336_v32 }
 0x6d0   : > { %v730_v40 = vpack.c.bf16 %v729_v38, %v729_v38 }
 0x6d2   : > { %1216 = vmatmul.mubr.msk.bf16.vlgmr.msra.gmra.mrb[16].mxu0 %vm348_vm2, %v730_v40 }
 0x6d3   : > { %1226 = vmatpush3.bf16.xpose.msra.mxu0 %v837_v41  ;;  %1227 = vmatprep.mubr.msk.bf16.mxu0 %vm1507_vm0, %v1506_v0 }
 0x6d4   : > { %1237 = vmatprep.subr.bf16.mxu0 %v1506_v0 }
 0x6da   : > { %1228 = vmatmul.mubr.msk.bf16.vlgmr.msra.gmra.mrb[20].mxu0 %vm348_vm2, %v830_v42 }
 0x6db   : > { %1239 = vmatprep.mubr.msk.bf16.mxu0 %vm1507_vm0, %v1506_v0  ;;  %1238 = vmatpush3.bf16.msra.mxu0 %v948_v19 }
 0x7a5   : > { %v773_v45 = vpop.f32.mrb[16].mxu0 }
 0x7a6   : > { %v779_v46 = vpack.c.bf16 %v773_v45, %v773_v45  ;;  %v1217_v47 = vpop.f32.mrb[17].mxu0 }
 0x7a7   : > { %v776_v48 = vpop.f32.mrb[18].mxu0 }
 0x7a8   : > { %v1218_v49 = vpop.f32.mrb[19].mxu0  ;;  %1222 = vmatmul.mubr.msk.bf16.vlgmr.msra.gmra.mrb[16].mxu1 %vm348_vm2, %v779_v46 }
 0x7a9   : > { %1233 = vmatprep.mubr.msk.bf16.mxu1 %vm1507_vm0, %v1506_v0 }
 0x7ad   : > { %v873_v50 = vpop.f32.mrb[20].mxu0 }
 0x7ae   : > { %v879_v51 = vmul.f32 0.35355338, %v873_v50  ;;  %v1229_v52 = vpop.f32.mrb[21].mxu0 }
 0x7af   : > { %v876_v53 = vpop.f32.mrb[22].mxu0 }
 0x7b0   : > { %v1230_v54 = vpop.f32.mrb[23].mxu0  ;;  %v880_v55 = vsel %vm343_vm3, %v879_v51, -1e+30 }
 0x7b1   : > { %v881_v56 = vsel %vm348_vm2, %v880_v55, -inf }
 0x7b2   : > { %882 = vmax.xlane.f32.xlu0 %v881_v56 }
 0x7c8   : > { %893 = vrot.lane.b32.xlu0 %v1746_v10, %s1518_s29 }
 0x83f   : > { %v883_v57 = vpop.xlane.xlu0 %882 }
 0x840   : > { %v884_v58 = vsub.f32 %v880_v55, %v883_v57 }
 0x842   : > { %v885_v59 = vmul.f32 1.442695, %v884_v58 }
 0x843   : > { %v894_v60 = vpop.permute.xlu0 %893 }
 0x844   : > { %1339 = vpow2.f32 %v885_v59  ;;  %v899_v0 = vsel %vm414_vm4, %v894_v60, 0 }
 0x845   : > { %1232 = vmatpush3.bf16.msra.mxu1 %v899_v0 }
 0x84e   : > { %v1340_v61 = vpop.eup %1339 }
 0x84f   : > { %v887_v62 = vsel %vm348_vm2, %v1340_v61, 0.0 }
 0x850   : > { %888 = vadd.xlane.f32.xlu1 %v887_v62 }
 0x87b   : > { %v822_v63 = vpop.f32.mrb[16].mxu1 }
 0x87c   : > { %v828_v1 = vadd.f32 %v822_v63, %v1807_v16  ;;  %v1223_v10 = vpop.f32.mrb[17].mxu1 }
 0x87d   : > { %v825_v2 = vpop.f32.mrb[18].mxu1 }
 0x87e   : > { %v1224_v3 = vpop.f32.mrb[19].mxu1 }
 0x8dd   : > { %v889_v4 = vpop.xlane.xlu1 %888 }
 0x8de   : > { %1341 = vrcp.f32 %v889_v4 }
 0x8e8   : > { %v1342_v5 = vpop.eup %1341 }
 0x8e9   : > { %v891_v6 = vmul.f32 %v1342_v5, %v1340_v61 }
 0x8eb   : > { %v892_v7 = vpack.c.bf16 %v891_v6, %v891_v6 }
 0x8ed   : > { %1234 = vmatmul.mubr.msk.bf16.vlgmr.msra.gmra.mrb[20].mxu1 %vm348_vm2, %v892_v7 }
 0x9c0   : > { %v935_v8 = vpop.f32.mrb[20].mxu1 }
 0x9c1   : > { %v941_v9 = vpack.c.bf16 %v935_v8, %v935_v8  ;;  %v1235_v11 = vpop.f32.mrb[21].mxu1 }
 0x9c2   : > { %v938_v12 = vpop.f32.mrb[22].mxu1 }
 0x9c3   : > { %v1236_v13 = vpop.f32.mrb[23].mxu1  ;;  %1240 = vmatmul.mubr.msk.bf16.vlgmr.msra.gmra.mrb[24].mxu0 %vm348_vm2, %v941_v9 }
 0xa96   : > { %v984_v14 = vpop.f32.mrb[24].mxu0 }
 0xa97   : > { %v990_v16 = vadd.f32 %v984_v14, %v828_v1  ;;  %v1241_v17 = vpop.f32.mrb[25].mxu0 }
 0xa98   : > { %v987_v20 = vpop.f32.mrb[26].mxu0 }
 0xa99   : > { %v998_v21 = vadd.f32 %v1131_v15, %v990_v16  ;;  %v1242_v22 = vpop.f32.mrb[27].mxu0 }
 0xa9b   : > { %999 = vst [vmem:[%s268_s8] sm:$0xff] %v998_v21 }
 0xa9c   : > { %1442 = shalt.err (!%p1439_p2)
}
 0xa9d   : > { %s1443_s12 = scalar_lea.hbm %s1852_s7, 128  ;;  %s1447_s29 = scalar_lea.hbm %s1901_s5, 256 }
 0xa9e   : > { %p1444_p13 = scmp.ne.s32.totalorder %s1852_s7, %s1443_s12  ;;  %p1448_p4 = scmp.lt.u32.totalorder %s1852_s7, %s1901_s5 }
 0xa9f   : > { %p1449_p5 = scmp.lt.u32.totalorder %s1447_s29, %s1443_s12  ;;  %p1451_p11 = scmp.lt.u32.totalorder %s1443_s12, %s1852_s7 }
 0xaa0   : > { %p1445_p6 = pnand %p1444_p13, %p1915_p0 }
 0xaa1   : > { %p1450_p8 = por %p1449_p5, %p1448_p4 }
 0xaa2   : > { %p1446_p10 = pneg %p1445_p6 }
 0xaa3   : > { %p1452_p1 = por %p1451_p11, %p1450_p8 }
 0xaa5   : > { %p1453_p3 = pnand %p1452_p1, %p1446_p10 }
 0xaa7   : > { %1456 = shalt.err (!%p1453_p3)
}
 0xaa8   : > { %1253 = dma.vmem_to_hbm [thread:$0]  (%p1915_p0), %s1854_s10, 128, %s1852_s7, %s1001_s22  }
 0xaa9 PF: > { %s1026_s26 = sand.u32 1, %s1487_s18   ;;  %p1916_p7 = scmp.ne.s32.totalorder %s1906_s25, 0 }
 0xaaa   : > { %p1917_p9 = scmp.ge.s32.totalorder %s1499_s21, 2  ;;  %s1027_s8 = scalar_lea.sflag [#allocation4], %s1026_s26 }
 0xaac   : > { %p1267_p12 = pnand %p1917_p9, %p1916_p7 }
 0xaae   : > { %1482 = dma.done.wait (!%p1267_p12), %s1027_s8, 128  }
 0xaaf   : > { %1484 = vsyncadd (!%p1267_p12), %s1027_s8, 4294967168  ;;  %p19_p2 = scmp.ge.s32.totalorder %s1660_s14, 4   ;;  %s1918_s18 = smov %s1491_s19 }
 0xab0   : > { %s1919_s19 = smov %s1495_s20  ;;  %s1920_s20 = smov %s1676_s27 }
 0xab1   : > { %s1921_s21 = smov %s1660_s14  ;;  %21 = sbr.rel (!%p19_p2) target bundleno = 6 (0x6), region = 96 }
 0xab8   :  { %1032 = vsyncpa [#allocation3], 1 }
 0xab9   :  { %1034 = vsyncpa [#allocation3 + $0x1], 1 }
 0xaba   :  { %1035 = vsyncpa [#allocation6], 1 }
 0xabb   :  { %1036 = vsyncpa [#allocation4], 1 }
 0xabc   :  { %1038 = vsyncpa [#allocation4 + $0x1], 1 }

</bundles_post_ra>
